<compile_context>
chip_gen: v5e
topology: v5e:2x2
jax: 0.10.0
libtpu: 0.0.40
codegen_flags: <defaults>
</compile_context>

<pallas_src>
import functools

import jax
import jax.numpy as jnp
from jax.experimental import pallas as pl
from jax.experimental.pallas import tpu as pltpu

LN_EPS = 1e-5


def _layernorm(x, w, b):
    mu = jnp.mean(x, axis=-1, keepdims=True)
    var = jnp.mean((x - mu) ** 2, axis=-1, keepdims=True)
    return (x - mu) * jax.lax.rsqrt(var + LN_EPS) * w + b


def _gelu_exact(x):
    # PyTorch nn.GELU default is the exact (erf-based) GELU.
    return 0.5 * x * (1.0 + jax.lax.erf(x * (2.0 ** -0.5)))


def vpt_block_kernel(prompt_ref, x_ref,
                     ln1w_ref, ln1b_ref,
                     wqkv_ref,
                     wproj_ref, bproj_ref,
                     ln2w_ref, ln2b_ref,
                     wfc1_ref, bfc1_ref,
                     wfc2_ref, bfc2_ref,
                     o_ref,
                     attn_scratch,
                     *, num_heads, scale):
    bf16 = jnp.bfloat16

    # ---- build the prompt-prepended token sequence in VMEM ----
    prompt = prompt_ref[0].astype(jnp.float32)        # (T, C)
    xb = x_ref[0].astype(jnp.float32)                 # (L, C)
    x = jnp.concatenate([prompt, xb], axis=0)         # (N, C), N = T + L
    N, C = x.shape
    hd = C // num_heads

    # ---- norm1 + fused QKV projection (bf16 operands, f32 accumulation) ----
    xn = _layernorm(x, ln1w_ref[0], ln1b_ref[0])
    qkv = jnp.dot(xn.astype(bf16), wqkv_ref[...],
                  preferred_element_type=jnp.float32)             # (N, 3C) f32

    # C-aligned splits (free views when C % 128 == 0); fold softmax scale
    # into q once instead of scaling every (N, N) score tile.
    q_all = (qkv[:, :C] * scale).astype(bf16)
    k_all = qkv[:, C:2 * C].astype(bf16)
    v_all = qkv[:, 2 * C:].astype(bf16)

    # ---- multi-head attention ----
    # Head outputs are written into a VMEM scratch at their lane offsets,
    # so there is no jnp.concatenate relayout and the output projection
    # remains one full-contraction (N, C) @ (C, C) matmul.
    for h in range(num_heads):
        sl = slice(h * hd, (h + 1) * hd)
        q = q_all[:, sl]                                           # (N, hd)
        k = k_all[:, sl]
        v = v_all[:, sl]
        s = jnp.dot(q, k.T, preferred_element_type=jnp.float32)   # (N, N) f32
        s = s - jnp.max(s, axis=-1, keepdims=True)
        p = jnp.exp(s)
        p = p * pl.reciprocal(jnp.sum(p, axis=-1, keepdims=True), approx=True)
        head_out = jnp.dot(p.astype(bf16), v,
                           preferred_element_type=jnp.float32)    # (N, hd)
        attn_scratch[:, sl] = head_out.astype(bf16)

    attn_out = (jnp.dot(attn_scratch[...], wproj_ref[...],
                        preferred_element_type=jnp.float32) + bproj_ref[0])

    # ---- residual 1 ----
    x1 = x + attn_out

    # ---- norm2 + MLP (exact erf GELU, matching nn.GELU default) ----
    x1n = _layernorm(x1, ln2w_ref[0], ln2b_ref[0])
    h1 = (jnp.dot(x1n.astype(bf16), wfc1_ref[...],
                  preferred_element_type=jnp.float32) + bfc1_ref[0])
    h1 = _gelu_exact(h1)
    h2 = (jnp.dot(h1.astype(bf16), wfc2_ref[...],
                  preferred_element_type=jnp.float32) + bfc2_ref[0])

    # ---- residual 2 ----
    o_ref[0] = (x1 + h2).astype(o_ref.dtype)


def vpt_block(x, params, num_heads):
    B, L, C = x.shape
    T = params["prompt"].shape[1]
    N = T + L
    hidden = params["wfc1"].shape[1]
    scale = (C // num_heads) ** (-0.5)

    # MXU weights in bf16 (ideally stored bf16 in a real deployment); biases
    # and LayerNorm affine params stay f32 (added after f32 accumulation).
    bf16 = jnp.bfloat16
    wqkv = params["wqkv"].astype(bf16)
    wproj = params["wproj"].astype(bf16)
    wfc1 = params["wfc1"].astype(bf16)
    wfc2 = params["wfc2"].astype(bf16)

    kernel = functools.partial(vpt_block_kernel,
                               num_heads=num_heads, scale=scale)

    def rep(shape):  # grid-invariant (replicated) operand: fetched only once
        return pl.BlockSpec(shape, lambda b, _n=len(shape): (0,) * _n)

    grid_spec = pltpu.PrefetchScalarGridSpec(
        num_scalar_prefetch=0,
        grid=(B,),
        in_specs=[
            rep((1, T, C)),                                 # prompt embeddings
            pl.BlockSpec((1, L, C), lambda b: (b, 0, 0)),   # x (per-batch tile)
            rep((1, C)), rep((1, C)),                       # ln1 w, b
            rep((C, 3 * C)),                                # qkv weight (bias=False)
            rep((C, C)), rep((1, C)),                       # proj w, b
            rep((1, C)), rep((1, C)),                       # ln2 w, b
            rep((C, hidden)), rep((1, hidden)),             # fc1 w, b
            rep((hidden, C)), rep((1, C)),                  # fc2 w, b
        ],
        out_specs=pl.BlockSpec((1, N, C), lambda b: (b, 0, 0)),
        scratch_shapes=[pltpu.VMEM((N, C), jnp.bfloat16)],  # per-head writeback
    )

    out_full = pl.pallas_call(
        kernel,
        out_shape=jax.ShapeDtypeStruct((B, N, C), x.dtype),
        grid_spec=grid_spec,
        compiler_params=pltpu.CompilerParams(
            dimension_semantics=("parallel",),
            vmem_limit_bytes=48 * 1024 * 1024),
    )(params["prompt"], x,
      params["ln1_w"], params["ln1_b"],
      wqkv,
      wproj, params["bproj"],
      params["ln2_w"], params["ln2_b"],
      wfc1, params["bfc1"],
      wfc2, params["bfc2"])

    # VPTBlock returns only the original (non-prompt) tokens: x[:, -L:].
    return out_full[:, T:]


# ------------------------- pure-JAX reference -------------------------
def vpt_block_ref(x, params, num_heads):
    B, L, C = x.shape
    T = params["prompt"].shape[1]
    N = T + L
    hd = C // num_heads
    scale = hd ** (-0.5)

    def ln(v, w, b):
        mu = jnp.mean(v, axis=-1, keepdims=True)
        var = jnp.mean((v - mu) ** 2, axis=-1, keepdims=True)
        return (v - mu) / jnp.sqrt(var + LN_EPS) * w[0] + b[0]

    prompt = jnp.broadcast_to(params["prompt"], (B, T, C))
    xf = jnp.concatenate([prompt, x], axis=1)           # (B, N, C)

    xn = ln(xf, params["ln1_w"], params["ln1_b"])
    qkv = xn @ params["wqkv"]                            # (B, N, 3C)
    qkv = qkv.reshape(B, N, 3, num_heads, hd).transpose(2, 0, 3, 1, 4)
    q, k, v = qkv[0], qkv[1], qkv[2]
    attn = jnp.einsum("bhnd,bhmd->bhnm", q, k) * scale
    attn = jax.nn.softmax(attn, axis=-1)
    out = jnp.einsum("bhnm,bhmd->bhnd", attn, v)
    out = out.transpose(0, 2, 1, 3).reshape(B, N, C)
    out = out @ params["wproj"] + params["bproj"][0]

    x1 = xf + out
    x1n = ln(x1, params["ln2_w"], params["ln2_b"])
    h = x1n @ params["wfc1"] + params["bfc1"][0]
    h = 0.5 * h * (1.0 + jax.lax.erf(h * (2.0 ** -0.5)))
    h = h @ params["wfc2"] + params["bfc2"][0]
    return (x1 + h)[:, T:]


if __name__ == "__main__":
    B, L, C = 2, 11, 32
    num_heads = 4
    num_tokens = 5                      # VPTBlock default
    mlp_ratio = 4.0
    hidden = int(C * mlp_ratio)

    key = jax.random.PRNGKey(0)
    ks = jax.random.split(key, 12)

    params = {
        "prompt": 0.1 * jax.random.normal(ks[11], (1, num_tokens, C), jnp.float32),
        "ln1_w": jnp.ones((1, C), jnp.float32),
        "ln1_b": 0.01 * jax.random.normal(ks[0], (1, C), jnp.float32),
        "wqkv": 0.05 * jax.random.normal(ks[1], (C, 3 * C), jnp.float32),
        "wproj": 0.05 * jax.random.normal(ks[2], (C, C), jnp.float32),
        "bproj": 0.01 * jax.random.normal(ks[3], (1, C), jnp.float32),
        "ln2_w": jnp.ones((1, C), jnp.float32),
        "ln2_b": 0.01 * jax.random.normal(ks[4], (1, C), jnp.float32),
        "wfc1": 0.05 * jax.random.normal(ks[5], (C, hidden), jnp.float32),
        "bfc1": 0.01 * jax.random.normal(ks[6], (1, hidden), jnp.float32),
        "wfc2": 0.05 * jax.random.normal(ks[7], (hidden, C), jnp.float32),
        "bfc2": 0.01 * jax.random.normal(ks[8], (1, C), jnp.float32),
    }

    x = jax.random.normal(ks[9], (B, L, C), jnp.float32)

    out = vpt_block(x, params, num_heads)
    out = jax.block_until_ready(out)

    ref = vpt_block_ref(x, params, num_heads)
    assert out.shape == (B, L, C)
    max_err = float(jnp.max(jnp.abs(out - ref)))
    # bf16 MXU operands + approx reciprocal -> relaxed tolerance vs f32 reference.
    assert jnp.allclose(out, ref, rtol=2e-2, atol=2e-2), max_err

    print("KERNEL_OK")
</pallas_src>

<mosaic_0001>
module attributes {stable_mosaic.version = 11 : i64} {
  func.func @vpt_block_kernel(%arg0: i32, %arg1: memref<1x5x32xf32, #tpu.memory_space<vmem>>, %arg2: memref<1x11x32xf32, #tpu.memory_space<vmem>>, %arg3: memref<1x32xf32, #tpu.memory_space<vmem>>, %arg4: memref<1x32xf32, #tpu.memory_space<vmem>>, %arg5: memref<32x96xbf16, #tpu.memory_space<vmem>>, %arg6: memref<32x32xbf16, #tpu.memory_space<vmem>>, %arg7: memref<1x32xf32, #tpu.memory_space<vmem>>, %arg8: memref<1x32xf32, #tpu.memory_space<vmem>>, %arg9: memref<1x32xf32, #tpu.memory_space<vmem>>, %arg10: memref<32x128xbf16, #tpu.memory_space<vmem>>, %arg11: memref<1x128xf32, #tpu.memory_space<vmem>>, %arg12: memref<128x32xbf16, #tpu.memory_space<vmem>>, %arg13: memref<1x32xf32, #tpu.memory_space<vmem>>, %arg14: memref<1x16x32xf32, #tpu.memory_space<vmem>>, %arg15: memref<16x32xbf16, #tpu.memory_space<vmem>>) attributes {dimension_semantics = [#tpu.dimension_semantics<parallel>], iteration_bounds = array<i64: 2>, scalar_prefetch = 0 : i64, scratch_operands = 1 : i64, tpu.core_type = #tpu.core_type<tc>, window_params = [{pipeline_mode = #tpu.pipeline_mode<synchronous>, transform_indices = @transform_0, window_bounds = array<i64: 1, 5, 32>}, {transform_indices = @transform_1, window_bounds = array<i64: 1, 11, 32>}, {pipeline_mode = #tpu.pipeline_mode<synchronous>, transform_indices = @transform_2, window_bounds = array<i64: 1, 32>}, {pipeline_mode = #tpu.pipeline_mode<synchronous>, transform_indices = @transform_3, window_bounds = array<i64: 1, 32>}, {pipeline_mode = #tpu.pipeline_mode<synchronous>, transform_indices = @transform_4, window_bounds = array<i64: 32, 96>}, {pipeline_mode = #tpu.pipeline_mode<synchronous>, transform_indices = @transform_5, window_bounds = array<i64: 32, 32>}, {pipeline_mode = #tpu.pipeline_mode<synchronous>, transform_indices = @transform_6, window_bounds = array<i64: 1, 32>}, {pipeline_mode = #tpu.pipeline_mode<synchronous>, transform_indices = @transform_7, window_bounds = array<i64: 1, 32>}, {pipeline_mode = #tpu.pipeline_mode<synchronous>, transform_indices = @transform_8, window_bounds = array<i64: 1, 32>}, {pipeline_mode = #tpu.pipeline_mode<synchronous>, transform_indices = @transform_9, window_bounds = array<i64: 32, 128>}, {pipeline_mode = #tpu.pipeline_mode<synchronous>, transform_indices = @transform_10, window_bounds = array<i64: 1, 128>}, {pipeline_mode = #tpu.pipeline_mode<synchronous>, transform_indices = @transform_11, window_bounds = array<i64: 128, 32>}, {pipeline_mode = #tpu.pipeline_mode<synchronous>, transform_indices = @transform_12, window_bounds = array<i64: 1, 32>}, {transform_indices = @transform_13, window_bounds = array<i64: 1, 16, 32>}]} {
    %c0 = arith.constant 0 : index
    %c0_0 = arith.constant 0 : index
    %c0_1 = arith.constant 0 : index
    %0 = vector.load %arg1[%c0, %c0_0, %c0_1] : memref<1x5x32xf32, #tpu.memory_space<vmem>>, vector<1x5x32xf32>
    %1 = vector.shape_cast %0 : vector<1x5x32xf32> to vector<5x32xf32>
    %c0_2 = arith.constant 0 : index
    %c0_3 = arith.constant 0 : index
    %c0_4 = arith.constant 0 : index
    %2 = vector.load %arg2[%c0_2, %c0_3, %c0_4] : memref<1x11x32xf32, #tpu.memory_space<vmem>>, vector<1x11x32xf32>
    %3 = vector.shape_cast %2 : vector<1x11x32xf32> to vector<11x32xf32>
    %4 = tpu.concatenate %1, %3 in 0 : vector<5x32xf32>, vector<11x32xf32> -> vector<16x32xf32>
    %c0_5 = arith.constant 0 : index
    %c0_6 = arith.constant 0 : index
    %5 = vector.load %arg3[%c0_5, %c0_6] : memref<1x32xf32, #tpu.memory_space<vmem>>, vector<1x32xf32>
    %6 = vector.shape_cast %5 : vector<1x32xf32> to vector<32xf32>
    %c0_7 = arith.constant 0 : index
    %c0_8 = arith.constant 0 : index
    %7 = vector.load %arg4[%c0_7, %c0_8] : memref<1x32xf32, #tpu.memory_space<vmem>>, vector<1x32xf32>
    %8 = vector.shape_cast %7 : vector<1x32xf32> to vector<32xf32>
    %cst = arith.constant dense<0.000000e+00> : vector<16xf32>
    %9 = vector.multi_reduction <add>, %4, %cst [1] : vector<16x32xf32> to vector<16xf32>
    %10 = vector.shape_cast %9 : vector<16xf32> to vector<16x1xf32>
    %cst_9 = arith.constant 3.200000e+01 : f32
    %11 = vector.broadcast %cst_9 : f32 to vector<16x1xf32>
    %12 = arith.divf %10, %11 : vector<16x1xf32>
    %13 = vector.broadcast %12 : vector<16x1xf32> to vector<16x32xf32>
    %14 = arith.subf %4, %13 : vector<16x32xf32>
    %15 = arith.mulf %14, %14 : vector<16x32xf32>
    %cst_10 = arith.constant dense<0.000000e+00> : vector<16xf32>
    %16 = vector.multi_reduction <add>, %15, %cst_10 [1] : vector<16x32xf32> to vector<16xf32>
    %17 = vector.shape_cast %16 : vector<16xf32> to vector<16x1xf32>
    %cst_11 = arith.constant 3.200000e+01 : f32
    %18 = vector.broadcast %cst_11 : f32 to vector<16x1xf32>
    %19 = arith.divf %17, %18 : vector<16x1xf32>
    %20 = vector.broadcast %12 : vector<16x1xf32> to vector<16x32xf32>
    %21 = arith.subf %4, %20 : vector<16x32xf32>
    %cst_12 = arith.constant 9.99999974E-6 : f32
    %22 = vector.broadcast %cst_12 : f32 to vector<16x1xf32>
    %23 = arith.addf %19, %22 : vector<16x1xf32>
    %24 = math.rsqrt %23 : vector<16x1xf32>
    %25 = vector.broadcast %24 : vector<16x1xf32> to vector<16x32xf32>
    %26 = arith.mulf %21, %25 : vector<16x32xf32>
    %27 = vector.shape_cast %6 : vector<32xf32> to vector<1x32xf32>
    %28 = vector.broadcast %27 : vector<1x32xf32> to vector<16x32xf32>
    %29 = arith.mulf %26, %28 : vector<16x32xf32>
    %30 = vector.shape_cast %8 : vector<32xf32> to vector<1x32xf32>
    %31 = vector.broadcast %30 : vector<1x32xf32> to vector<16x32xf32>
    %32 = arith.addf %29, %31 : vector<16x32xf32>
    %33 = arith.truncf %32 : vector<16x32xf32> to vector<16x32xbf16>
    %c0_13 = arith.constant 0 : index
    %c0_14 = arith.constant 0 : index
    %34 = vector.load %arg5[%c0_13, %c0_14] : memref<32x96xbf16, #tpu.memory_space<vmem>>, vector<32x96xbf16>
    %cst_15 = arith.constant dense<0.000000e+00> : vector<16x96xf32>
    %35 = tpu.matmul %33, %34, %cst_15 {dimension_numbers = #tpu.dot_dimension_numbers<[1], [0], [0], [1], [0, 0, 1, 1], [], []>} : vector<16x32xbf16>, vector<32x96xbf16>, vector<16x96xf32> -> vector<16x96xf32>
    %36 = vector.extract_strided_slice %35 {offsets = [0, 0], sizes = [16, 32], strides = [1, 1]} : vector<16x96xf32> to vector<16x32xf32>
    %cst_16 = arith.constant 0.353553385 : f32
    %37 = vector.broadcast %cst_16 : f32 to vector<16x32xf32>
    %38 = arith.mulf %36, %37 : vector<16x32xf32>
    %39 = arith.truncf %38 : vector<16x32xf32> to vector<16x32xbf16>
    %40 = vector.extract_strided_slice %35 {offsets = [0, 32], sizes = [16, 32], strides = [1, 1]} : vector<16x96xf32> to vector<16x32xf32>
    %41 = arith.truncf %40 : vector<16x32xf32> to vector<16x32xbf16>
    %42 = vector.extract_strided_slice %35 {offsets = [0, 64], sizes = [16, 32], strides = [1, 1]} : vector<16x96xf32> to vector<16x32xf32>
    %43 = arith.truncf %42 : vector<16x32xf32> to vector<16x32xbf16>
    %44 = vector.extract_strided_slice %39 {offsets = [0, 0], sizes = [16, 8], strides = [1, 1]} : vector<16x32xbf16> to vector<16x8xbf16>
    %45 = vector.extract_strided_slice %41 {offsets = [0, 0], sizes = [16, 8], strides = [1, 1]} : vector<16x32xbf16> to vector<16x8xbf16>
    %46 = vector.extract_strided_slice %43 {offsets = [0, 0], sizes = [16, 8], strides = [1, 1]} : vector<16x32xbf16> to vector<16x8xbf16>
    %47 = tpu.transpose %45, [1, 0] : vector<16x8xbf16> -> vector<8x16xbf16>
    %cst_17 = arith.constant dense<0.000000e+00> : vector<16x16xf32>
    %48 = tpu.matmul %44, %47, %cst_17 {dimension_numbers = #tpu.dot_dimension_numbers<[1], [0], [0], [1], [0, 0, 1, 1], [], []>} : vector<16x8xbf16>, vector<8x16xbf16>, vector<16x16xf32> -> vector<16x16xf32>
    %cst_18 = arith.constant dense<0xFF800000> : vector<16xf32>
    %49 = vector.multi_reduction <maximumf>, %48, %cst_18 [1] : vector<16x16xf32> to vector<16xf32>
    %50 = vector.shape_cast %49 : vector<16xf32> to vector<16x1xf32>
    %51 = vector.broadcast %50 : vector<16x1xf32> to vector<16x16xf32>
    %52 = arith.subf %48, %51 : vector<16x16xf32>
    %53 = math.exp %52 : vector<16x16xf32>
    %cst_19 = arith.constant dense<0.000000e+00> : vector<16xf32>
    %54 = vector.multi_reduction <add>, %53, %cst_19 [1] : vector<16x16xf32> to vector<16xf32>
    %55 = vector.shape_cast %54 : vector<16xf32> to vector<16x1xf32>
    %56 = tpu.reciprocal %55 {approx = true} : vector<16x1xf32> -> vector<16x1xf32>
    %57 = vector.broadcast %56 : vector<16x1xf32> to vector<16x16xf32>
    %58 = arith.mulf %53, %57 : vector<16x16xf32>
    %59 = arith.truncf %58 : vector<16x16xf32> to vector<16x16xbf16>
    %cst_20 = arith.constant dense<0.000000e+00> : vector<16x8xf32>
    %60 = tpu.matmul %59, %46, %cst_20 {dimension_numbers = #tpu.dot_dimension_numbers<[1], [0], [0], [1], [0, 0, 1, 1], [], []>} : vector<16x16xbf16>, vector<16x8xbf16>, vector<16x8xf32> -> vector<16x8xf32>
    %61 = arith.truncf %60 : vector<16x8xf32> to vector<16x8xbf16>
    %c0_21 = arith.constant 0 : index
    %c0_22 = arith.constant 0 : index
    %62 = vector.load %arg15[%c0_21, %c0_22] : memref<16x32xbf16, #tpu.memory_space<vmem>>, vector<16x8xbf16>
    tpu.vector_store %arg15[%c0_21, %c0_22], %61 {strides = array<i32>} : memref<16x32xbf16, #tpu.memory_space<vmem>>, vector<16x8xbf16>,
    %63 = vector.extract_strided_slice %39 {offsets = [0, 8], sizes = [16, 8], strides = [1, 1]} : vector<16x32xbf16> to vector<16x8xbf16>
    %64 = vector.extract_strided_slice %41 {offsets = [0, 8], sizes = [16, 8], strides = [1, 1]} : vector<16x32xbf16> to vector<16x8xbf16>
    %65 = vector.extract_strided_slice %43 {offsets = [0, 8], sizes = [16, 8], strides = [1, 1]} : vector<16x32xbf16> to vector<16x8xbf16>
    %66 = tpu.transpose %64, [1, 0] : vector<16x8xbf16> -> vector<8x16xbf16>
    %cst_23 = arith.constant dense<0.000000e+00> : vector<16x16xf32>
    %67 = tpu.matmul %63, %66, %cst_23 {dimension_numbers = #tpu.dot_dimension_numbers<[1], [0], [0], [1], [0, 0, 1, 1], [], []>} : vector<16x8xbf16>, vector<8x16xbf16>, vector<16x16xf32> -> vector<16x16xf32>
    %cst_24 = arith.constant dense<0xFF800000> : vector<16xf32>
    %68 = vector.multi_reduction <maximumf>, %67, %cst_24 [1] : vector<16x16xf32> to vector<16xf32>
    %69 = vector.shape_cast %68 : vector<16xf32> to vector<16x1xf32>
    %70 = vector.broadcast %69 : vector<16x1xf32> to vector<16x16xf32>
    %71 = arith.subf %67, %70 : vector<16x16xf32>
    %72 = math.exp %71 : vector<16x16xf32>
    %cst_25 = arith.constant dense<0.000000e+00> : vector<16xf32>
    %73 = vector.multi_reduction <add>, %72, %cst_25 [1] : vector<16x16xf32> to vector<16xf32>
    %74 = vector.shape_cast %73 : vector<16xf32> to vector<16x1xf32>
    %75 = tpu.reciprocal %74 {approx = true} : vector<16x1xf32> -> vector<16x1xf32>
    %76 = vector.broadcast %75 : vector<16x1xf32> to vector<16x16xf32>
    %77 = arith.mulf %72, %76 : vector<16x16xf32>
    %78 = arith.truncf %77 : vector<16x16xf32> to vector<16x16xbf16>
    %cst_26 = arith.constant dense<0.000000e+00> : vector<16x8xf32>
    %79 = tpu.matmul %78, %65, %cst_26 {dimension_numbers = #tpu.dot_dimension_numbers<[1], [0], [0], [1], [0, 0, 1, 1], [], []>} : vector<16x16xbf16>, vector<16x8xbf16>, vector<16x8xf32> -> vector<16x8xf32>
    %80 = arith.truncf %79 : vector<16x8xf32> to vector<16x8xbf16>
    %c0_27 = arith.constant 0 : index
    %c8 = arith.constant 8 : index
    %81 = vector.load %arg15[%c0_27, %c8] : memref<16x32xbf16, #tpu.memory_space<vmem>>, vector<16x8xbf16>
    tpu.vector_store %arg15[%c0_27, %c8], %80 {strides = array<i32>} : memref<16x32xbf16, #tpu.memory_space<vmem>>, vector<16x8xbf16>,
    %82 = vector.extract_strided_slice %39 {offsets = [0, 16], sizes = [16, 8], strides = [1, 1]} : vector<16x32xbf16> to vector<16x8xbf16>
    %83 = vector.extract_strided_slice %41 {offsets = [0, 16], sizes = [16, 8], strides = [1, 1]} : vector<16x32xbf16> to vector<16x8xbf16>
    %84 = vector.extract_strided_slice %43 {offsets = [0, 16], sizes = [16, 8], strides = [1, 1]} : vector<16x32xbf16> to vector<16x8xbf16>
    %85 = tpu.transpose %83, [1, 0] : vector<16x8xbf16> -> vector<8x16xbf16>
    %cst_28 = arith.constant dense<0.000000e+00> : vector<16x16xf32>
    %86 = tpu.matmul %82, %85, %cst_28 {dimension_numbers = #tpu.dot_dimension_numbers<[1], [0], [0], [1], [0, 0, 1, 1], [], []>} : vector<16x8xbf16>, vector<8x16xbf16>, vector<16x16xf32> -> vector<16x16xf32>
    %cst_29 = arith.constant dense<0xFF800000> : vector<16xf32>
    %87 = vector.multi_reduction <maximumf>, %86, %cst_29 [1] : vector<16x16xf32> to vector<16xf32>
    %88 = vector.shape_cast %87 : vector<16xf32> to vector<16x1xf32>
    %89 = vector.broadcast %88 : vector<16x1xf32> to vector<16x16xf32>
    %90 = arith.subf %86, %89 : vector<16x16xf32>
    %91 = math.exp %90 : vector<16x16xf32>
    %cst_30 = arith.constant dense<0.000000e+00> : vector<16xf32>
    %92 = vector.multi_reduction <add>, %91, %cst_30 [1] : vector<16x16xf32> to vector<16xf32>
    %93 = vector.shape_cast %92 : vector<16xf32> to vector<16x1xf32>
    %94 = tpu.reciprocal %93 {approx = true} : vector<16x1xf32> -> vector<16x1xf32>
    %95 = vector.broadcast %94 : vector<16x1xf32> to vector<16x16xf32>
    %96 = arith.mulf %91, %95 : vector<16x16xf32>
    %97 = arith.truncf %96 : vector<16x16xf32> to vector<16x16xbf16>
    %cst_31 = arith.constant dense<0.000000e+00> : vector<16x8xf32>
    %98 = tpu.matmul %97, %84, %cst_31 {dimension_numbers = #tpu.dot_dimension_numbers<[1], [0], [0], [1], [0, 0, 1, 1], [], []>} : vector<16x16xbf16>, vector<16x8xbf16>, vector<16x8xf32> -> vector<16x8xf32>
    %99 = arith.truncf %98 : vector<16x8xf32> to vector<16x8xbf16>
    %c0_32 = arith.constant 0 : index
    %c16 = arith.constant 16 : index
    %100 = vector.load %arg15[%c0_32, %c16] : memref<16x32xbf16, #tpu.memory_space<vmem>>, vector<16x8xbf16>
    tpu.vector_store %arg15[%c0_32, %c16], %99 {strides = array<i32>} : memref<16x32xbf16, #tpu.memory_space<vmem>>, vector<16x8xbf16>,
    %101 = vector.extract_strided_slice %39 {offsets = [0, 24], sizes = [16, 8], strides = [1, 1]} : vector<16x32xbf16> to vector<16x8xbf16>
    %102 = vector.extract_strided_slice %41 {offsets = [0, 24], sizes = [16, 8], strides = [1, 1]} : vector<16x32xbf16> to vector<16x8xbf16>
    %103 = vector.extract_strided_slice %43 {offsets = [0, 24], sizes = [16, 8], strides = [1, 1]} : vector<16x32xbf16> to vector<16x8xbf16>
    %104 = tpu.transpose %102, [1, 0] : vector<16x8xbf16> -> vector<8x16xbf16>
    %cst_33 = arith.constant dense<0.000000e+00> : vector<16x16xf32>
    %105 = tpu.matmul %101, %104, %cst_33 {dimension_numbers = #tpu.dot_dimension_numbers<[1], [0], [0], [1], [0, 0, 1, 1], [], []>} : vector<16x8xbf16>, vector<8x16xbf16>, vector<16x16xf32> -> vector<16x16xf32>
    %cst_34 = arith.constant dense<0xFF800000> : vector<16xf32>
    %106 = vector.multi_reduction <maximumf>, %105, %cst_34 [1] : vector<16x16xf32> to vector<16xf32>
    %107 = vector.shape_cast %106 : vector<16xf32> to vector<16x1xf32>
    %108 = vector.broadcast %107 : vector<16x1xf32> to vector<16x16xf32>
    %109 = arith.subf %105, %108 : vector<16x16xf32>
    %110 = math.exp %109 : vector<16x16xf32>
    %cst_35 = arith.constant dense<0.000000e+00> : vector<16xf32>
    %111 = vector.multi_reduction <add>, %110, %cst_35 [1] : vector<16x16xf32> to vector<16xf32>
    %112 = vector.shape_cast %111 : vector<16xf32> to vector<16x1xf32>
    %113 = tpu.reciprocal %112 {approx = true} : vector<16x1xf32> -> vector<16x1xf32>
    %114 = vector.broadcast %113 : vector<16x1xf32> to vector<16x16xf32>
    %115 = arith.mulf %110, %114 : vector<16x16xf32>
    %116 = arith.truncf %115 : vector<16x16xf32> to vector<16x16xbf16>
    %cst_36 = arith.constant dense<0.000000e+00> : vector<16x8xf32>
    %117 = tpu.matmul %116, %103, %cst_36 {dimension_numbers = #tpu.dot_dimension_numbers<[1], [0], [0], [1], [0, 0, 1, 1], [], []>} : vector<16x16xbf16>, vector<16x8xbf16>, vector<16x8xf32> -> vector<16x8xf32>
    %118 = arith.truncf %117 : vector<16x8xf32> to vector<16x8xbf16>
    %c0_37 = arith.constant 0 : index
    %c24 = arith.constant 24 : index
    %119 = vector.load %arg15[%c0_37, %c24] : memref<16x32xbf16, #tpu.memory_space<vmem>>, vector<16x8xbf16>
    tpu.vector_store %arg15[%c0_37, %c24], %118 {strides = array<i32>} : memref<16x32xbf16, #tpu.memory_space<vmem>>, vector<16x8xbf16>,
    %c0_38 = arith.constant 0 : index
    %c0_39 = arith.constant 0 : index
    %120 = vector.load %arg15[%c0_38, %c0_39] : memref<16x32xbf16, #tpu.memory_space<vmem>>, vector<16x32xbf16>
    %c0_40 = arith.constant 0 : index
    %c0_41 = arith.constant 0 : index
    %121 = vector.load %arg6[%c0_40, %c0_41] : memref<32x32xbf16, #tpu.memory_space<vmem>>, vector<32x32xbf16>
    %cst_42 = arith.constant dense<0.000000e+00> : vector<16x32xf32>
    %122 = tpu.matmul %120, %121, %cst_42 {dimension_numbers = #tpu.dot_dimension_numbers<[1], [0], [0], [1], [0, 0, 1, 1], [], []>} : vector<16x32xbf16>, vector<32x32xbf16>, vector<16x32xf32> -> vector<16x32xf32>
    %c0_43 = arith.constant 0 : index
    %c0_44 = arith.constant 0 : index
    %123 = vector.load %arg7[%c0_43, %c0_44] : memref<1x32xf32, #tpu.memory_space<vmem>>, vector<1x32xf32>
    %124 = vector.shape_cast %123 : vector<1x32xf32> to vector<32xf32>
    %125 = vector.shape_cast %124 : vector<32xf32> to vector<1x32xf32>
    %126 = vector.broadcast %125 : vector<1x32xf32> to vector<16x32xf32>
    %127 = arith.addf %122, %126 : vector<16x32xf32>
    %128 = arith.addf %4, %127 : vector<16x32xf32>
    %c0_45 = arith.constant 0 : index
    %c0_46 = arith.constant 0 : index
    %129 = vector.load %arg8[%c0_45, %c0_46] : memref<1x32xf32, #tpu.memory_space<vmem>>, vector<1x32xf32>
    %130 = vector.shape_cast %129 : vector<1x32xf32> to vector<32xf32>
    %c0_47 = arith.constant 0 : index
    %c0_48 = arith.constant 0 : index
    %131 = vector.load %arg9[%c0_47, %c0_48] : memref<1x32xf32, #tpu.memory_space<vmem>>, vector<1x32xf32>
    %132 = vector.shape_cast %131 : vector<1x32xf32> to vector<32xf32>
    %cst_49 = arith.constant dense<0.000000e+00> : vector<16xf32>
    %133 = vector.multi_reduction <add>, %128, %cst_49 [1] : vector<16x32xf32> to vector<16xf32>
    %134 = vector.shape_cast %133 : vector<16xf32> to vector<16x1xf32>
    %cst_50 = arith.constant 3.200000e+01 : f32
    %135 = vector.broadcast %cst_50 : f32 to vector<16x1xf32>
    %136 = arith.divf %134, %135 : vector<16x1xf32>
    %137 = vector.broadcast %136 : vector<16x1xf32> to vector<16x32xf32>
    %138 = arith.subf %128, %137 : vector<16x32xf32>
    %139 = arith.mulf %138, %138 : vector<16x32xf32>
    %cst_51 = arith.constant dense<0.000000e+00> : vector<16xf32>
    %140 = vector.multi_reduction <add>, %139, %cst_51 [1] : vector<16x32xf32> to vector<16xf32>
    %141 = vector.shape_cast %140 : vector<16xf32> to vector<16x1xf32>
    %cst_52 = arith.constant 3.200000e+01 : f32
    %142 = vector.broadcast %cst_52 : f32 to vector<16x1xf32>
    %143 = arith.divf %141, %142 : vector<16x1xf32>
    %144 = vector.broadcast %136 : vector<16x1xf32> to vector<16x32xf32>
    %145 = arith.subf %128, %144 : vector<16x32xf32>
    %cst_53 = arith.constant 9.99999974E-6 : f32
    %146 = vector.broadcast %cst_53 : f32 to vector<16x1xf32>
    %147 = arith.addf %143, %146 : vector<16x1xf32>
    %148 = math.rsqrt %147 : vector<16x1xf32>
    %149 = vector.broadcast %148 : vector<16x1xf32> to vector<16x32xf32>
    %150 = arith.mulf %145, %149 : vector<16x32xf32>
    %151 = vector.shape_cast %130 : vector<32xf32> to vector<1x32xf32>
    %152 = vector.broadcast %151 : vector<1x32xf32> to vector<16x32xf32>
    %153 = arith.mulf %150, %152 : vector<16x32xf32>
    %154 = vector.shape_cast %132 : vector<32xf32> to vector<1x32xf32>
    %155 = vector.broadcast %154 : vector<1x32xf32> to vector<16x32xf32>
    %156 = arith.addf %153, %155 : vector<16x32xf32>
    %157 = arith.truncf %156 : vector<16x32xf32> to vector<16x32xbf16>
    %c0_54 = arith.constant 0 : index
    %c0_55 = arith.constant 0 : index
    %158 = vector.load %arg10[%c0_54, %c0_55] : memref<32x128xbf16, #tpu.memory_space<vmem>>, vector<32x128xbf16>
    %cst_56 = arith.constant dense<0.000000e+00> : vector<16x128xf32>
    %159 = tpu.matmul %157, %158, %cst_56 {dimension_numbers = #tpu.dot_dimension_numbers<[1], [0], [0], [1], [0, 0, 1, 1], [], []>} : vector<16x32xbf16>, vector<32x128xbf16>, vector<16x128xf32> -> vector<16x128xf32>
    %c0_57 = arith.constant 0 : index
    %c0_58 = arith.constant 0 : index
    %160 = vector.load %arg11[%c0_57, %c0_58] : memref<1x128xf32, #tpu.memory_space<vmem>>, vector<1x128xf32>
    %161 = vector.shape_cast %160 : vector<1x128xf32> to vector<128xf32>
    %162 = vector.shape_cast %161 : vector<128xf32> to vector<1x128xf32>
    %163 = vector.broadcast %162 : vector<1x128xf32> to vector<16x128xf32>
    %164 = arith.addf %159, %163 : vector<16x128xf32>
    %cst_59 = arith.constant 5.000000e-01 : f32
    %165 = vector.broadcast %cst_59 : f32 to vector<16x128xf32>
    %166 = arith.mulf %165, %164 : vector<16x128xf32>
    %cst_60 = arith.constant 0.707106769 : f32
    %167 = vector.broadcast %cst_60 : f32 to vector<16x128xf32>
    %168 = arith.mulf %164, %167 : vector<16x128xf32>
    %169 = math.erf %168 : vector<16x128xf32>
    %cst_61 = arith.constant 1.000000e+00 : f32
    %170 = vector.broadcast %cst_61 : f32 to vector<16x128xf32>
    %171 = arith.addf %170, %169 : vector<16x128xf32>
    %172 = arith.mulf %166, %171 : vector<16x128xf32>
    %173 = arith.truncf %172 : vector<16x128xf32> to vector<16x128xbf16>
    %c0_62 = arith.constant 0 : index
    %c0_63 = arith.constant 0 : index
    %174 = vector.load %arg12[%c0_62, %c0_63] : memref<128x32xbf16, #tpu.memory_space<vmem>>, vector<128x32xbf16>
    %cst_64 = arith.constant dense<0.000000e+00> : vector<16x32xf32>
    %175 = tpu.matmul %173, %174, %cst_64 {dimension_numbers = #tpu.dot_dimension_numbers<[1], [0], [0], [1], [0, 0, 1, 1], [], []>} : vector<16x128xbf16>, vector<128x32xbf16>, vector<16x32xf32> -> vector<16x32xf32>
    %c0_65 = arith.constant 0 : index
    %c0_66 = arith.constant 0 : index
    %176 = vector.load %arg13[%c0_65, %c0_66] : memref<1x32xf32, #tpu.memory_space<vmem>>, vector<1x32xf32>
    %177 = vector.shape_cast %176 : vector<1x32xf32> to vector<32xf32>
    %178 = vector.shape_cast %177 : vector<32xf32> to vector<1x32xf32>
    %179 = vector.broadcast %178 : vector<1x32xf32> to vector<16x32xf32>
    %180 = arith.addf %175, %179 : vector<16x32xf32>
    %181 = arith.addf %128, %180 : vector<16x32xf32>
    %c0_67 = arith.constant 0 : index
    %c0_68 = arith.constant 0 : index
    %c0_69 = arith.constant 0 : index
    %182 = vector.load %arg14[%c0_67, %c0_68, %c0_69] : memref<1x16x32xf32, #tpu.memory_space<vmem>>, vector<1x16x32xf32>
    %183 = vector.shape_cast %182 : vector<1x16x32xf32> to vector<16x32xf32>
    %184 = vector.shape_cast %181 : vector<16x32xf32> to vector<1x16x32xf32>
    tpu.vector_store %arg14[%c0_67, %c0_68, %c0_69], %184 {strides = array<i32>} : memref<1x16x32xf32, #tpu.memory_space<vmem>>, vector<1x16x32xf32>,
    return
  }
  func.func @transform_0(%arg0: i32) -> (i32, i32, i32) {
    %c0_i32 = arith.constant 0 : i32
    %c0_i32_0 = arith.constant 0 : i32
    %c0_i32_1 = arith.constant 0 : i32
    %c0_i32_2 = arith.constant 0 : i32
    return %c0_i32, %c0_i32_0, %c0_i32_1 : i32, i32, i32
  }
  func.func @transform_1(%arg0: i32) -> (i32, i32, i32) {
    %c0_i32 = arith.constant 0 : i32
    %c0_i32_0 = arith.constant 0 : i32
    %c0_i32_1 = arith.constant 0 : i32
    return %arg0, %c0_i32, %c0_i32_0 : i32, i32, i32
  }
  func.func @transform_2(%arg0: i32) -> (i32, i32) {
    %c0_i32 = arith.constant 0 : i32
    %c0_i32_0 = arith.constant 0 : i32
    %c0_i32_1 = arith.constant 0 : i32
    return %c0_i32, %c0_i32_0 : i32, i32
  }
  func.func @transform_3(%arg0: i32) -> (i32, i32) {
    %c0_i32 = arith.constant 0 : i32
    %c0_i32_0 = arith.constant 0 : i32
    %c0_i32_1 = arith.constant 0 : i32
    return %c0_i32, %c0_i32_0 : i32, i32
  }
  func.func @transform_4(%arg0: i32) -> (i32, i32) {
    %c0_i32 = arith.constant 0 : i32
    %c0_i32_0 = arith.constant 0 : i32
    %c0_i32_1 = arith.constant 0 : i32
    return %c0_i32, %c0_i32_0 : i32, i32
  }
  func.func @transform_5(%arg0: i32) -> (i32, i32) {
    %c0_i32 = arith.constant 0 : i32
    %c0_i32_0 = arith.constant 0 : i32
    %c0_i32_1 = arith.constant 0 : i32
    return %c0_i32, %c0_i32_0 : i32, i32
  }
  func.func @transform_6(%arg0: i32) -> (i32, i32) {
    %c0_i32 = arith.constant 0 : i32
    %c0_i32_0 = arith.constant 0 : i32
    %c0_i32_1 = arith.constant 0 : i32
    return %c0_i32, %c0_i32_0 : i32, i32
  }
  func.func @transform_7(%arg0: i32) -> (i32, i32) {
    %c0_i32 = arith.constant 0 : i32
    %c0_i32_0 = arith.constant 0 : i32
    %c0_i32_1 = arith.constant 0 : i32
    return %c0_i32, %c0_i32_0 : i32, i32
  }
  func.func @transform_8(%arg0: i32) -> (i32, i32) {
    %c0_i32 = arith.constant 0 : i32
    %c0_i32_0 = arith.constant 0 : i32
    %c0_i32_1 = arith.constant 0 : i32
    return %c0_i32, %c0_i32_0 : i32, i32
  }
  func.func @transform_9(%arg0: i32) -> (i32, i32) {
    %c0_i32 = arith.constant 0 : i32
    %c0_i32_0 = arith.constant 0 : i32
    %c0_i32_1 = arith.constant 0 : i32
    return %c0_i32, %c0_i32_0 : i32, i32
  }
  func.func @transform_10(%arg0: i32) -> (i32, i32) {
    %c0_i32 = arith.constant 0 : i32
    %c0_i32_0 = arith.constant 0 : i32
    %c0_i32_1 = arith.constant 0 : i32
    return %c0_i32, %c0_i32_0 : i32, i32
  }
  func.func @transform_11(%arg0: i32) -> (i32, i32) {
    %c0_i32 = arith.constant 0 : i32
    %c0_i32_0 = arith.constant 0 : i32
    %c0_i32_1 = arith.constant 0 : i32
    return %c0_i32, %c0_i32_0 : i32, i32
  }
  func.func @transform_12(%arg0: i32) -> (i32, i32) {
    %c0_i32 = arith.constant 0 : i32
    %c0_i32_0 = arith.constant 0 : i32
    %c0_i32_1 = arith.constant 0 : i32
    return %c0_i32, %c0_i32_0 : i32, i32
  }
  func.func @transform_13(%arg0: i32) -> (i32, i32, i32) {
    %c0_i32 = arith.constant 0 : i32
    %c0_i32_0 = arith.constant 0 : i32
    %c0_i32_1 = arith.constant 0 : i32
    return %arg0, %c0_i32, %c0_i32_0 : i32, i32, i32
  }
}

</mosaic_0001>

<bundles_post_ra>
// kernel: tpu_custom_call.1
= control target key start
LH: loop header
LB: loop body
LE: loop exit
PB: predicated region body
PF: predicated region fallthrough
CT: control target
= control target key end

     0   :  { %s1888_s0 = inlined_call_operand.vmem [shape: f32[1,5,32], index: 0, kind: input, shape index: {}]   ;;  %s1889_s1 = inlined_call_operand.vmem [shape: f32[2,11,32], index: 1, kind: input, shape index: {}]   ;;  %s1890_s2 = inlined_call_operand.vmem [shape: f32[1,32], index: 2, kind: input, shape index: {}]   ;;  %s1891_s3 = inlined_call_operand.vmem [shape: f32[1,32], index: 3, kind: input, shape index: {}]   ;;  %s1892_s4 = inlined_call_operand.vmem [shape: bf16[32,96], index: 4, kind: input, shape index: {}]   ;;  %s1893_s5 = inlined_call_operand.vmem [shape: bf16[32,32], index: 5, kind: input, shape index: {}]   ;;  %s1894_s6 = inlined_call_operand.vmem [shape: f32[1,32], index: 6, kind: input, shape index: {}]   ;;  %s1895_s7 = inlined_call_operand.vmem [shape: f32[1,32], index: 7, kind: input, shape index: {}]   ;;  %s1896_s8 = inlined_call_operand.vmem [shape: f32[1,32], index: 8, kind: input, shape index: {}]   ;;  %s1897_s9 = inlined_call_operand.vmem [shape: bf16[32,128], index: 9, kind: input, shape index: {}]   ;;  %s1898_s10 = inlined_call_operand.vmem [shape: f32[1,128], index: 10, kind: input, shape index: {}]   ;;  %s1899_s11 = inlined_call_operand.vmem [shape: bf16[128,32], index: 11, kind: input, shape index: {}]   ;;  %s1900_s12 = inlined_call_operand.vmem [shape: f32[1,32], index: 12, kind: input, shape index: {}]   ;;  %s1901_s13 = inlined_call_operand.hbm [shape: f32[2,16,32], index: 13, kind: output, shape index: {}]  }
   0x1   :  { %1903 = sst [smem:[#allocation6_spill]] %s1888_s0 }
   0x2   :  { %1904 = sst [smem:[#allocation7_spill]] %s1889_s1 }
   0x3   :  { %1905 = sst [smem:[#allocation8_spill]] %s1890_s2 }
   0x4   :  { %18 = vsyncpa [#allocation4], 0 }
   0x5   :  { %20 = vsyncpa [#allocation4 + $0x1], 0  ;;  %s1631_s25 = smov 0   ;;  %s1633_s26 = smov 0  }
   0x6   :  { %s1635_s27 = smov 0   ;;  %s1637_s28 = smov 0  }
   0x7 LB: > { %s1652_s29 = sadd.s32 4294967295, %s1543_s28   ;;  %s1271_s30 = sadd.s32 4294967294, %s1543_s28   ;;  %s1543_s28 = sphi %s1637_s28, %s1915_s28   ;;  %s1539_s27 = sphi %s1635_s27, %s1914_s27   ;;  %s1535_s26 = sphi %s1633_s26, %s1913_s26   ;;  %s1531_s25 = sphi %s1631_s25, %s1912_s25  }
   0x8   : > { %s1656_s14 = sadd.s32 1, %s1543_s28   ;;  %s311_s15 = sadd.s32 1, %s1539_s27 }
   0x9   : > { %s308_s16 = ssub.s32 %s1543_s28, %s1656_s14  ;;  %p321_p0 = scmp.ne.s32.totalorder %s1539_s27, %s1535_s26 }
   0xa   : > { %p309_p1 = scmp.eq.s32.totalorder %s308_s16, 0  ;;  %p322_p2 = scmp.eq.s32.totalorder %s1652_s29, 1 }
   0xb   : > { %p327_p3 = scmp.ne.s32.totalorder %s1535_s26, %s1531_s25  ;;  %p328_p4 = scmp.eq.s32.totalorder %s1271_s30, 1 }
   0xc   : > { %s1667_s17 = scalar_select %p309_p1, %s1539_s27, %s311_s15  }
   0xd   : > { %p1669_p5 = por %p322_p2, %p321_p0  ;;  %p1673_p6 = por %p328_p4, %p327_p3 }
   0xe   : > { %p1274_p7 = scmp.ge.s32.totalorder %s1543_s28, 1  ;;  %p390_p8 = scmp.lt.s32.totalorder %s1543_s28, 3 }
  0x10   : > { %p391_p9 = pnand %p1274_p7, %p390_p8 }
  0x11   : > { %p434_p10 = scmp.lt.s32.totalorder (!%p391_p9), %s1652_s29, 1  ;;  %s1908_s1 = sld [smem:[#allocation7_spill]] (!%p391_p9) }
  0x12   : > { %394 = sbr.rel (%p391_p9) target bundleno = 2393 (0x959), region = 72  ;;  %s1909_s0 = sld [smem:[#allocation6_spill]] (!%p391_p9) }
  0x13   : > { %s1910_s2 = sld [smem:[#allocation8_spill]] (!%p391_p9)  ;;  %s1546_s16 = smov (!%p391_p9), 64  }
  0x14   : > { %s1549_s22 = smov (!%p391_p9), 120   ;;  %s1550_s23 = smov (!%p391_p9), 88  }
  0x15   : > { %s1552_s30 = smov (!%p391_p9), 104   ;;  %s1553_s15 = smov (!%p391_p9), 112  }
  0x17   : > { %s435_s20 = scalar_select %p434_p10, %s1652_s29, 1  ;;  %vm445_vm0 = vcmask 1044480   ;;  %vm454_vm1 = vcmask 261120   ;;  %v1545_v9 = vmov 32.0   ;;  %v1358_v26 = vld [vmem:[%s1892_s4 + $0x8] sm:$0xff]  ;;  %v1357_v28 = vld [vmem:[%s1892_s4] sm:$0xff] }
  0x18   : > { %v440_v0 = vld [vmem:[%s1909_s0] sm:$0x1f]  ;;  %1435 = vrcp.f32 %v1545_v9  ;;  %542 = vmatpush.bf16.msra.mxu0 %v1358_v26  ;;  %vm568_vm9 = vcmask 64512   ;;  %vm589_vm10 = vcmask 130048   ;;  %vm635_vm11 = vcmask 60416  }
  0x19   : > { %s1356_s21 = sshll.u32 %s435_s20, 4  ;;  %v1428_v47 = vld [vmem:[%s1910_s2] ss:$0 sm:$0xff]  ;;  %s1547_s20 = smov 96   ;;  %vm715_vm12 = vcmask 126016   ;;  %vm795_vm13 = vcmask 191616  }
  0x1a   : > { %s438_s24 = scalar_lea.vmem %s1908_s1, %s1356_s21  ;;  %v1429_v52 = vld [vmem:[%s1891_s3] ss:$0 sm:$0xff]  ;;  %s1548_s21 = smov 72   ;;  %vm875_vm14 = vcmask 257216  }
  0x1b   : > { %v441_v1 = vld [vmem:[%s438_s24] sm:$0xff]  ;;  %v442_v2 = vld [vmem:[%s438_s24 + $0x8] sm:$0x7]  ;;  %s1551_s24 = smov 80  }
  0x1c   : > { %v446_v3 = vrot.slane %v441_v1, 3  ;;  %v447_v5 = vrot.slane %v442_v2, 3  ;;  %543 = vmatpush.bf16.msra.mxu0 %v1357_v28 }
  0x1e   : > { %v1687_v4 = vsel %vm445_vm0, %v440_v0, %v446_v3  ;;  %v1691_v7 = vsel %vm445_vm0, %v446_v3, %v447_v5  ;;  %v1436_v10 = vpop.eup %1435 }
  0x1f   : > { %v455_v6 = vsel %vm454_vm1, %v1687_v4, 0.0  ;;  %v458_v8 = vsel %vm454_vm1, %v1691_v7, 0.0  ;;  %v462_v11 = vmul.f32 32.0, %v1436_v10  ;;  %vm466_vm2 = vweird.f32 %v1436_v10 }
  0x20   : > { %456 = vadd.xlane.f32.xlu0 %v455_v6 }
  0x21   : > { %v463_v12 = vsub.f32 1.0, %v462_v11 }
  0x23   : > { %v464_v13 = vmul.f32 %v1436_v10, %v463_v12 }
  0x25   : > { %v465_v14 = vadd.f32 %v1436_v10, %v464_v13 }
  0x27   : > { %v1695_v15 = vsel %vm466_vm2, %v1436_v10, %v465_v14 }
  0x28   : > { %459 = vadd.xlane.f32.xlu0 %v458_v8 }
  0x93   : > { %v457_v16 = vpop.xlane.xlu0 %456 }
  0x94   : > { %v468_v17 = vmul.f32 %v1695_v15, %v457_v16 }
  0x96   : > { %v470_v18 = vsub.f32 %v1687_v4, %v468_v17 }
  0x98   : > { %v472_v19 = vmul.f32 %v470_v18, %v470_v18 }
  0x9a   : > { %v474_v20 = vsel %vm454_vm1, %v472_v19, 0.0 }
  0x9b   : > { %475 = vadd.xlane.f32.xlu1 %v474_v20  ;;  %v460_v21 = vpop.xlane.xlu0 %459 }
  0x9c   : > { %v469_v22 = vmul.f32 %v1695_v15, %v460_v21 }
  0x9e   : > { %v471_v23 = vsub.f32 %v1691_v7, %v469_v22 }
  0xa0   : > { %v473_v24 = vmul.f32 %v471_v23, %v471_v23 }
  0xa2   : > { %v477_v25 = vsel %vm454_vm1, %v473_v24, 0.0 }
  0xa3   : > { %478 = vadd.xlane.f32.xlu1 %v477_v25 }
 0x10e   : > { %v476_v27 = vpop.xlane.xlu1 %475 }
 0x10f   : > { %v480_v29 = vmul.f32 %v476_v27, %v1695_v15 }
 0x111   : > { %v482_v30 = vadd.f32 1e-05, %v480_v29 }
 0x113   : > { %1437 = vrsqrt.f32 %v482_v30  ;;  %vm490_vm4 = vweird.f32 %v482_v30 }
 0x116   : > { %v479_v31 = vpop.xlane.xlu1 %478 }
 0x117   : > { %v481_v32 = vmul.f32 %v479_v31, %v1695_v15 }
 0x119   : > { %v1438_v33 = vpop.eup %1437  ;;  %v483_v34 = vadd.f32 1e-05, %v481_v32 }
 0x11a   : > { %v485_v35 = vmul.f32 %v1438_v33, %v482_v30  ;;  %vm491_vm3 = vweird.f32 %v1438_v33 }
 0x11b   : > { %1439 = vrsqrt.f32 %v483_v34  ;;  %vm492_vm5 = vmor %vm490_vm4, %vm491_vm3  ;;  %vm500_vm7 = vweird.f32 %v483_v34 }
 0x11c   : > { %v486_v36 = vmul.f32 %v1438_v33, %v485_v35 }
 0x11e   : > { %v487_v37 = vmul.f32 0.5, %v486_v36 }
 0x120   : > { %v488_v38 = vsub.f32 1.5, %v487_v37 }
 0x121   : > { %v1440_v39 = vpop.eup %1439 }
 0x122   : > { %v489_v40 = vmul.f32 %v1438_v33, %v488_v38  ;;  %v495_v41 = vmul.f32 %v1440_v39, %v483_v34  ;;  %vm501_vm6 = vweird.f32 %v1440_v39 }
 0x123   : > { %vm502_vm8 = vmor %vm500_vm7, %vm501_vm6 }
 0x124   : > { %v496_v42 = vmul.f32 %v1440_v39, %v495_v41  ;;  %v493_v43 = vsel %vm492_vm5, %v1438_v33, %v489_v40 }
 0x125   : > { %v504_v46 = vmul.f32 %v493_v43, %v470_v18 }
 0x126   : > { %v497_v44 = vmul.f32 0.5, %v496_v42 }
 0x127   : > { %v509_v51 = vmul.f32 %v1428_v47, %v504_v46 }
 0x128   : > { %v498_v45 = vsub.f32 1.5, %v497_v44 }
 0x129   : > { %v514_v54 = vadd.f32 %v1429_v52, %v509_v51 }
 0x12a   : > { %v499_v48 = vmul.f32 %v1440_v39, %v498_v45 }
 0x12c   : > { %v503_v49 = vsel %vm502_vm8, %v1440_v39, %v499_v48 }
 0x12d   : > { %v505_v50 = vmul.f32 %v503_v49, %v471_v23 }
 0x12f   : > { %v510_v53 = vmul.f32 %v1428_v47, %v505_v50 }
 0x131   : > { %v515_v55 = vadd.f32 %v1429_v52, %v510_v53 }
 0x133   : > { %v516_v56 = vpack.c.bf16 %v515_v55, %v514_v54 }
 0x135   : > { %1286 = vmatmul.msk.bf16.vlgmr.msra.gmra.mxu0 %vm454_vm1, %v516_v56 }
 0x1b2   : > { %v545_v57 = vpop.f32.mrf.mxu0 }
 0x1b3   : > { %v554_v58 = vpack.c.bf16 %v545_v57, %v545_v57  ;;  %v550_v1 = vmul.f32 0.35355338, %v545_v57 }
 0x1b5   : > { %v563_v61 = vunpack.c.l.b16 %v554_v58  ;;  %v552_v5 = vpack.c.bf16 %v550_v1, %v550_v1 }
 0x1b7   : > { %v558_v9 = vunpack.c.l.b16 %v552_v5 }
 0x1ba   : > { %v547_v59 = vpop.f32.mrf.mxu0 }
 0x1bb   : > { %v555_v60 = vpack.c.bf16 %v547_v59, %v547_v59  ;;  %v551_v0 = vmul.f32 0.35355338, %v547_v59 }
 0x1bd   : > { %v564_v62 = vunpack.c.l.b16 %v555_v60  ;;  %v553_v2 = vpack.c.bf16 %v551_v0, %v551_v0 }
 0x1bf   : > { %v1718_v63 = vpack.c.b16 %v564_v62, %v563_v61  ;;  %v559_v8 = vunpack.c.l.b16 %v553_v2 }
 0x1c1   : > { %613 = vrot.lane.b32.xlu1 %v1718_v63, %s1546_s16  ;;  %566 = vrot.lane.b32.xlu2 %v1718_v63, %s1547_s20  ;;  %v560_v10 = vpack.c.b16 %v559_v8, %v558_v9  ;;  %s1554_s16 = smov 56   ;;  %s1555_s20 = smov 48  }
 0x21b   : > { %v567_v3 = vpop.permute.xlu2 %566 }
 0x21c   : > { %v573_v6 = vsel %vm568_vm9, %v567_v3, 0 }
 0x21d   : > { %582 = vmatpush.bf16.xpose.msra.mxu1 %v573_v6 }
 0x224   : > { %1287 = vmatmul.msk.bf16.vlgmr.msra.gmra.mxu1 %vm568_vm9, %v560_v10 }
 0x233   : > { %v614_v11 = vpop.permute.xlu1 %613 }
 0x234   : > { %626 = vmatpush.bf16.msra.mxu2 %v614_v11 }
 0x2a1   : > { %v584_v12 = vpop.f32.mrf.mxu1 }
 0x2a2   : > { %v590_v13 = vsel %vm589_vm10, %v584_v12, -inf }
 0x2a3   : > { %591 = vmax.xlane.f32.xlu2 %v590_v13 }
 0x2a9   : > { %v586_v14 = vpop.f32.mrf.mxu1 }
 0x2aa   : > { %v593_v16 = vsel %vm589_vm10, %v586_v14, -inf }
 0x2ab   : > { %594 = vmax.xlane.f32.xlu0 %v593_v16 }
 0x2bb   : > { %800 = vrot.lane.b32.xlu2 %v1718_v63, %s1548_s21  ;;  %s1556_s21 = smov 40  }
 0x316   : > { %v592_v17 = vpop.xlane.xlu2 %591 }
 0x317   : > { %v596_v18 = vsub.f32 %v584_v12, %v592_v17 }
 0x319   : > { %v598_v19 = vmul.f32 1.442695, %v596_v18 }
 0x31b   : > { %1441 = vpow2.f32 %v598_v19 }
 0x31e   : > { %v801_v20 = vpop.permute.xlu2 %800  ;;  %v595_v21 = vpop.xlane.xlu0 %594 }
 0x31f   : > { %v597_v22 = vsub.f32 %v586_v14, %v595_v21  ;;  %v806_v23 = vsel %vm568_vm9, %v801_v20, 0 }
 0x320   : > { %815 = vmatpush.bf16.xpose.msra.mxu3 %v806_v23 }
 0x321   : > { %v1442_v24 = vpop.eup %1441  ;;  %v600_v25 = vmul.f32 1.442695, %v597_v22 }
 0x322   : > { %v602_v26 = vsel %vm589_vm10, %v1442_v24, 0.0 }
 0x323   : > { %1443 = vpow2.f32 %v600_v25  ;;  %603 = vadd.xlane.f32.xlu1 %v602_v26 }
 0x329   : > { %v1444_v27 = vpop.eup %1443 }
 0x32a   : > { %v605_v28 = vsel %vm589_vm10, %v1444_v27, 0.0 }
 0x32b   : > { %606 = vadd.xlane.f32.xlu0 %v605_v28 }
 0x33c   : > { %638 = vrot.lane.b32.xlu1 %v560_v10, %s1549_s22  ;;  %s1902_s22 = smov 8  }
 0x33f   : > { %640 = vrot.lane.b32.xlu0 %v1718_v63, %s1550_s23  ;;  %s1558_s23 = smov 16  }
 0x344   : > { %720 = vrot.lane.b32.xlu1 %v1718_v63, %s1551_s24  ;;  %s1559_s24 = smov 24  }
 0x347   : > { %798 = vrot.lane.b32.xlu0 %v560_v10, %s1552_s30 }
 0x34f   : > { %718 = vrot.lane.b32.xlu0 %v560_v10, %s1553_s15  ;;  %s1372_s15 = sshll.u32 %s1652_s29, 4 }
 0x350   : > { %s1205_s0 = scalar_lea.hbm %s1901_s13, %s1372_s15  ;;  %s1501_s15 = scalar_lea.hbm %s1901_s13, 32 }
 0x351   : > { %s1208_s2 = sshll.u32 %s1205_s0, 4  ;;  %s1209_s2 = int_to_ptr.hbm [resolvable:$true] %s1208_s2 }
 0x396   : > { %v604_v29 = vpop.xlane.xlu1 %603 }
 0x397   : > { %1445 = vrcp.f32 %v604_v29 }
 0x39d   : > { %v1446_v31 = vpop.eup %1445 }
 0x39e   : > { %v607_v30 = vpop.xlane.xlu0 %606  ;;  %v610_v33 = vmul.f32 %v1446_v31, %v1442_v24 }
 0x39f   : > { %1447 = vrcp.f32 %v607_v30 }
 0x3a5   : > { %v1448_v32 = vpop.eup %1447 }
 0x3a6   : > { %v611_v34 = vmul.f32 %v1448_v32, %v1444_v27 }
 0x3a8   : > { %v612_v35 = vpack.c.bf16 %v611_v34, %v610_v33 }
 0x3aa   : > { %1288 = vmatmul.msk.bf16.vlgmr.msra.gmra.mxu2 %vm589_vm10, %v612_v35 }
 0x3ae   : > { %v639_v36 = vpop.permute.xlu1 %638 }
 0x3b1   : > { %v641_v37 = vpop.permute.xlu0 %640 }
 0x3b2   : > { %v646_v38 = vsel %vm568_vm9, %v641_v37, 0 }
 0x3b3   : > { %655 = vmatpush.bf16.xpose.msrb.mxu2 %v646_v38 }
 0x3b6   : > { %v721_v39 = vpop.permute.xlu1 %720 }
 0x3b7   : > { %v726_v40 = vsel %vm568_vm9, %v721_v39, 0 }
 0x3b8   : > { %735 = vmatpush.bf16.xpose.msrb.mxu0 %v726_v40 }
 0x3b9   : > { %v799_v41 = vpop.permute.xlu0 %798 }
 0x3ba   : > { %1289 = vmatmul.msk.bf16.vlgmr.msrb.gmra.mxu2 %vm568_vm9, %v639_v36  ;;  %1293 = vmatmul.msk.bf16.vlgmr.msra.gmra.mxu3 %vm568_vm9, %v799_v41 }
 0x3c1   : > { %v719_v42 = vpop.permute.xlu0 %718 }
 0x3c2   : > { %1291 = vmatmul.msk.bf16.vlgmr.msrb.gmra.mxu0 %vm568_vm9, %v719_v42 }
 0x42d   : > { %v628_v43 = vpop.f32.mrf.mxu2 }
 0x42e   : > { %v633_v44 = vpack.c.bf16 %v628_v43, %v628_v43 }
 0x430   : > { %636 = vst.msk [vmem:[#allocation2] sm:$0xf] %vm635_vm11, %v633_v44 }
 0x435   : > { %v630_v45 = vpop.f32.mrf.mxu2 }
 0x436   : > { %v634_v46 = vpack.c.bf16 %v630_v45, %v630_v45 }
 0x438   : > { %637 = vst.msk [vmem:[#allocation2 + $0x4] sm:$0xf] %vm635_vm11, %v634_v46 }
 0x43d   : > { %v657_v47 = vpop.f32.mrf.mxu2  ;;  %v817_v48 = vpop.f32.mrf.mxu3 }
 0x43e   : > { %v662_v49 = vsel %vm589_vm10, %v657_v47, -inf  ;;  %v822_v50 = vsel %vm589_vm10, %v817_v48, -inf }
 0x43f   : > { %663 = vmax.xlane.f32.xlu1 %v662_v49  ;;  %823 = vmax.xlane.f32.xlu2 %v822_v50  ;;  %v737_v51 = vpop.f32.mrf.mxu0 }
 0x440   : > { %v742_v58 = vsel %vm589_vm10, %v737_v51, -inf }
 0x445   : > { %v659_v52 = vpop.f32.mrf.mxu2  ;;  %v819_v53 = vpop.f32.mrf.mxu3 }
 0x446   : > { %v665_v54 = vsel %vm589_vm10, %v659_v52, -inf  ;;  %v825_v55 = vsel %vm589_vm10, %v819_v53, -inf }
 0x447   : > { %666 = vmax.xlane.f32.xlu0 %v665_v54  ;;  %826 = vmax.xlane.f32.xlu1 %v825_v55  ;;  %v739_v56 = vpop.f32.mrf.mxu0 }
 0x448   : > { %v745_v57 = vsel %vm589_vm10, %v739_v56, -inf }
 0x449   : > { %746 = vmax.xlane.f32.xlu2 %v745_v57 }
 0x44f   : > { %743 = vmax.xlane.f32.xlu0 %v742_v58 }
 0x461   : > { %685 = vrot.lane.b32.xlu2 %v1718_v63, %s1554_s16 }
 0x4b2   : > { %v664_v59 = vpop.xlane.xlu1 %663  ;;  %v824_v60 = vpop.xlane.xlu2 %823 }
 0x4b3   : > { %v828_v61 = vsub.f32 %v817_v48, %v824_v60  ;;  %v668_v13 = vsub.f32 %v657_v47, %v664_v59 }
 0x4b5   : > { %v830_v62 = vmul.f32 1.442695, %v828_v61  ;;  %v670_v20 = vmul.f32 1.442695, %v668_v13 }
 0x4b7   : > { %1449 = vpow2.f32 %v830_v62 }
 0x4ba   : > { %v827_v0 = vpop.xlane.xlu1 %826  ;;  %v667_v1 = vpop.xlane.xlu0 %666 }
 0x4bb   : > { %v829_v2 = vsub.f32 %v819_v53, %v827_v0  ;;  %v669_v17 = vsub.f32 %v659_v52, %v667_v1 }
 0x4bc   : > { %v747_v3 = vpop.xlane.xlu2 %746 }
 0x4bd   : > { %v832_v5 = vmul.f32 1.442695, %v829_v2  ;;  %v749_v6 = vsub.f32 %v739_v56, %v747_v3  ;;  %v1745_v8 = vpop.eup %1449  ;;  %v672_v21 = vmul.f32 1.442695, %v669_v17 }
 0x4be   : > { %v834_v9 = vsel %vm589_vm10, %v1745_v8, 0.0 }
 0x4bf   : > { %1451 = vpow2.f32 %v832_v5  ;;  %835 = vadd.xlane.f32.xlu1 %v834_v9  ;;  %v752_v10 = vmul.f32 1.442695, %v749_v6  ;;  %v1361_v5 = vld [vmem:[%s1893_s5 + $0x8] sm:$0xff]  ;;  %v1360_v6 = vld [vmem:[%s1893_s5] sm:$0xff] }
 0x4c0   : > { %914 = vmatpush.bf16.msra.mxu0 %v1361_v5 }
 0x4c1   : > { %1453 = vpow2.f32 %v752_v10 }
 0x4c2   : > { %v744_v11 = vpop.xlane.xlu0 %743 }
 0x4c3   : > { %v748_v12 = vsub.f32 %v737_v51, %v744_v11 }
 0x4c4   : > { %v686_v14 = vpop.permute.xlu2 %685  ;;  %915 = vmatpush.bf16.msra.mxu0 %v1360_v6 }
 0x4c5   : > { %v1452_v16 = vpop.eup %1451  ;;  %v750_v18 = vmul.f32 1.442695, %v748_v12  ;;  %698 = vmatpush.bf16.msra.mxu2 %v686_v14  ;;  %v1430_v12 = vld [vmem:[%s1894_s6] ss:$0 sm:$0xff] }
 0x4c6   : > { %v837_v19 = vsel %vm589_vm10, %v1452_v16, 0.0 }
 0x4c7   : > { %1455 = vpow2.f32 %v750_v18  ;;  %838 = vadd.xlane.f32.xlu0 %v837_v19  ;;  %v1454_v22 = vpop.eup %1453 }
 0x4c8   : > { %1457 = vpow2.f32 %v670_v20  ;;  %v757_v24 = vsel %vm589_vm10, %v1454_v22, 0.0 }
 0x4c9   : > { %1459 = vpow2.f32 %v672_v21 }
 0x4cd   : > { %v1456_v23 = vpop.eup %1455 }
 0x4ce   : > { %v754_v25 = vsel %vm589_vm10, %v1456_v23, 0.0  ;;  %v1458_v26 = vpop.eup %1457 }
 0x4cf   : > { %758 = vadd.xlane.f32.xlu0 %v757_v24  ;;  %755 = vadd.xlane.f32.xlu1 %v754_v25  ;;  %v1460_v27 = vpop.eup %1459  ;;  %v674_v29 = vsel %vm589_vm10, %v1458_v26, 0.0 }
 0x4d0   : > { %v677_v28 = vsel %vm589_vm10, %v1460_v27, 0.0 }
 0x4d7   : > { %678 = vadd.xlane.f32.xlu0 %v677_v28  ;;  %675 = vadd.xlane.f32.xlu1 %v674_v29 }
 0x4eb   : > { %765 = vrot.lane.b32.xlu0 %v1718_v63, %s1555_s20 }
 0x4f0   : > { %845 = vrot.lane.b32.xlu1 %v1718_v63, %s1556_s21  ;;  %s431_s21 = sand.u32 1, %s1535_s26  }
 0x4f1   : > { %s1275_s30 = sshll.u32 %s431_s21, 4  ;;  %s1194_s29 = scalar_lea.sflag [#allocation4], %s431_s21 }
 0x4f2   : > { %s433_s16 = scalar_lea.vmem [#allocation3], %s1275_s30 }
 0x4f3   : > { %s1206_s1 = sshll.u32 %s433_s16, 4  ;;  %s1207_s1 = int_to_ptr.vmem [resolvable:$true] %s1206_s1 }
 0x532   : > { %v836_v30 = vpop.xlane.xlu1 %835 }
 0x53a   : > { %v839_v31 = vpop.xlane.xlu0 %838 }
 0x542   : > { %v756_v32 = vpop.xlane.xlu1 %755  ;;  %v759_v33 = vpop.xlane.xlu0 %758 }
 0x54a   : > { %v676_v34 = vpop.xlane.xlu1 %675  ;;  %v679_v35 = vpop.xlane.xlu0 %678 }
 0x54b   : > { %1461 = vrcp.f32 %v676_v34 }
 0x54c   : > { %1463 = vrcp.f32 %v679_v35 }
 0x54d   : > { %1465 = vrcp.f32 %v756_v32 }
 0x54e   : > { %1467 = vrcp.f32 %v759_v33  ;;  %v1362_v33 = vld [vmem:[%s1897_s9] sm:$0xff] }
 0x54f   : > { %1469 = vrcp.f32 %v839_v31 }
 0x550   : > { %1471 = vrcp.f32 %v836_v30  ;;  %v1363_v30 = vld [vmem:[%s1897_s9 + $0x8] sm:$0xff] }
 0x551   : > { %v1462_v36 = vpop.eup %1461 }
 0x552   : > { %v1464_v37 = vpop.eup %1463  ;;  %v682_v38 = vmul.f32 %v1462_v36, %v1458_v26 }
 0x553   : > { %v683_v39 = vmul.f32 %v1464_v37, %v1460_v27  ;;  %v1466_v41 = vpop.eup %1465 }
 0x554   : > { %v1468_v42 = vpop.eup %1467  ;;  %v762_v63 = vmul.f32 %v1466_v41, %v1456_v23 }
 0x555   : > { %v684_v40 = vpack.c.bf16 %v683_v39, %v682_v38  ;;  %v763_v43 = vmul.f32 %v1468_v42, %v1454_v22  ;;  %v1470_v45 = vpop.eup %1469 }
 0x556   : > { %v1472_v47 = vpop.eup %1471  ;;  %v843_v48 = vmul.f32 %v1470_v45, %v1452_v16 }
 0x557   : > { %1290 = vmatmul.msk.bf16.vlgmr.msra.gmra.mxu2 %vm589_vm10, %v684_v40  ;;  %v764_v46 = vpack.c.bf16 %v763_v43, %v762_v63  ;;  %v842_v50 = vmul.f32 %v1472_v47, %v1745_v8 }
 0x559   : > { %v844_v51 = vpack.c.bf16 %v843_v48, %v842_v50 }
 0x55d   : > { %v766_v44 = vpop.permute.xlu0 %765 }
 0x55e   : > { %778 = vmatpush.bf16.msrb.mxu1 %v766_v44 }
 0x561   : > { %1292 = vmatmul.msk.bf16.vlgmr.msrb.gmra.mxu1 %vm589_vm10, %v764_v46 }
 0x562   : > { %v846_v49 = vpop.permute.xlu1 %845  ;;  %1010 = vmatpush.bf16.msra.mxu1 %v1363_v30  ;;  %v1366_v30 = vld [vmem:[%s1899_s11 + $0x10] sm:$0xff] }
 0x563   : > { %858 = vmatpush.bf16.msrb.mxu2 %v846_v49 }
 0x566   : > { %1011 = vmatpush.bf16.msra.mxu1 %v1362_v33 }
 0x567   : > { %1294 = vmatmul.msk.bf16.vlgmr.msrb.gmra.mxu2 %vm589_vm10, %v844_v51 }
 0x5da   : > { %v700_v52 = vpop.f32.mrf.mxu2 }
 0x5db   : > { %v705_v53 = vpack.c.bf16 %v700_v52, %v700_v52  ;;  %v1432_v52 = vld [vmem:[%s1896_s8] ss:$0 sm:$0xff] }
 0x5dd   : > { %709 = vrot.lane.b32.xlu2 %v705_v53, %s1902_s22 }
 0x5de   : > { %v780_v54 = vpop.f32.mrf.mxu1 }
 0x5df   : > { %v785_v55 = vpack.c.bf16 %v780_v54, %v780_v54 }
 0x5e1   : > { %789 = vrot.lane.b32.xlu0 %v785_v55, %s1558_s23 }
 0x5e2   : > { %v702_v56 = vpop.f32.mrf.mxu2 }
 0x5e3   : > { %v706_v57 = vpack.c.bf16 %v702_v56, %v702_v56 }
 0x5e5   : > { %711 = vrot.lane.b32.xlu2 %v706_v57, %s1902_s22 }
 0x5e6   : > { %v782_v58 = vpop.f32.mrf.mxu1 }
 0x5e7   : > { %v786_v60 = vpack.c.bf16 %v782_v58, %v782_v58 }
 0x5ea   : > { %v860_v59 = vpop.f32.mrf.mxu2 }
 0x5eb   : > { %v865_v61 = vpack.c.bf16 %v860_v59, %v860_v59  ;;  %v1433_v59 = vld [vmem:[%s1898_s10] ss:$0 sm:$0xff] }
 0x5ed   : > { %869 = vrot.lane.b32.xlu1 %v865_v61, %s1559_s24  ;;  %791 = vrot.lane.b32.xlu2 %v786_v60, %s1558_s23  ;;  %s1495_s23 = sshra.s32 %s1209_s2, 4  ;;  %s1496_s23 = int_to_ptr.hbm [resolvable:$true] %s1495_s23 }
 0x5ee   : > { %p1502_p0 = scmp.lt.s32.totalorder %s1496_s23, %s1901_s13 }
 0x5f2   : > { %v862_v62 = vpop.f32.mrf.mxu2 }
 0x5f3   : > { %v866_v0 = vpack.c.bf16 %v862_v62, %v862_v62  ;;  %v1371_v62 = vld [vmem:[%s1899_s11 + $0x38] sm:$0xff] }
 0x5f4   : > { %1175 = vmatpush.bf16.msrb.mxu3 %v1371_v62 }
 0x5f5   : > { %871 = vrot.lane.b32.xlu0 %v866_v0, %s1559_s24  ;;  %s1497_s24 = scalar_lea.hbm %s1496_s23, 16 }
 0x5f6   : > { %p1498_p11 = scmp.ne.s32.totalorder %s1496_s23, %s1497_s24  ;;  %p1503_p1 = scmp.lt.s32.totalorder %s1501_s15, %s1497_s24 }
 0x5f8   : > { %p1499_p12 = pnand %p1498_p11, %p1669_p5  ;;  %p1504_p2 = por %p1503_p1, %p1502_p0 }
 0x5fa   : > { %p1500_p13 = pneg %p1499_p12 }
 0x5fc   : > { %p1505_p3 = pnand %p1504_p2, %p1500_p13 }
 0x637   : > { %v710_v1 = vpop.permute.xlu2 %709 }
 0x638   : > { %716 = vst.msk [vmem:[#allocation2] sm:$0xf] %vm715_vm12, %v710_v1 }
 0x63f   : > { %v712_v2 = vpop.permute.xlu2 %711 }
 0x640   : > { %717 = vst.msk [vmem:[#allocation2 + $0x4] sm:$0xf] %vm715_vm12, %v712_v2  ;;  %v1370_v2 = vld [vmem:[%s1899_s11 + $0x30] sm:$0xff] }
 0x641   : > { %1176 = vmatpush.bf16.msrb.mxu3 %v1370_v2 }
 0x647   : > { %v792_v3 = vpop.permute.xlu2 %791 }
 0x648   : > { %797 = vst.msk [vmem:[#allocation2 + $0x4] sm:$0xf] %vm795_vm13, %v792_v3 }
 0x653   : > { %v790_v8 = vpop.permute.xlu0 %789 }
 0x654   : > { %796 = vst.msk [vmem:[#allocation2] sm:$0xf] %vm795_vm13, %v790_v8 }
 0x65f   : > { %v870_v9 = vpop.permute.xlu1 %869 }
 0x660   : > { %876 = vst.msk [vmem:[#allocation2] sm:$0xf] %vm875_vm14, %v870_v9 }
 0x667   : > { %v872_v10 = vpop.permute.xlu0 %871 }
 0x668   : > { %877 = vst.msk [vmem:[#allocation2 + $0x4] sm:$0xf] %vm875_vm14, %v872_v10  ;;  %v1369_v10 = vld [vmem:[%s1899_s11 + $0x28] sm:$0xff] }
 0x669   : > { %1177 = vmatpush.bf16.msrb.mxu3 %v1369_v10 }
 0x66f   : > { %v1359_v11 = vld [vmem:[#allocation2] sm:$0xff] }
 0x670   : > { %1307 = vmatmul.msk.bf16.vlgmr.msra.gmra.mxu0 %vm454_vm1, %v1359_v11 }
 0x6ed   : > { %v917_v13 = vpop.f32.mrf.mxu0 }
 0x6ee   : > { %v918_v14 = vadd.f32 %v1430_v12, %v917_v13 }
 0x6f0   : > { %v1773_v16 = vadd.f32 %v918_v14, %v1687_v4 }
 0x6f2   : > { %v926_v17 = vsel %vm454_vm1, %v1773_v16, 0.0 }
 0x6f3   : > { %927 = vadd.xlane.f32.xlu2 %v926_v17  ;;  %v1368_v17 = vld [vmem:[%s1899_s11 + $0x20] sm:$0xff] }
 0x6f4   : > { %1178 = vmatpush.bf16.msrb.mxu3 %v1368_v17 }
 0x6f5   : > { %v919_v18 = vpop.f32.mrf.mxu0 }
 0x6f6   : > { %v920_v19 = vadd.f32 %v1430_v12, %v919_v18 }
 0x6f8   : > { %v1778_v20 = vadd.f32 %v920_v19, %v1691_v7 }
 0x6fa   : > { %v929_v21 = vsel %vm454_vm1, %v1778_v20, 0.0 }
 0x6fb   : > { %930 = vadd.xlane.f32.xlu1 %v929_v21 }
 0x766   : > { %v928_v22 = vpop.xlane.xlu2 %927 }
 0x767   : > { %v932_v23 = vmul.f32 %v928_v22, %v1695_v15 }
 0x769   : > { %v934_v24 = vsub.f32 %v1773_v16, %v932_v23 }
 0x76b   : > { %v936_v4 = vmul.f32 %v934_v24, %v934_v24 }
 0x76d   : > { %v938_v25 = vsel %vm454_vm1, %v936_v4, 0.0 }
 0x76e   : > { %v931_v26 = vpop.xlane.xlu1 %930  ;;  %939 = vadd.xlane.f32.xlu0 %v938_v25 }
 0x76f   : > { %v933_v27 = vmul.f32 %v931_v26, %v1695_v15 }
 0x771   : > { %v935_v28 = vsub.f32 %v1778_v20, %v933_v27 }
 0x773   : > { %v937_v7 = vmul.f32 %v935_v28, %v935_v28 }
 0x775   : > { %v941_v29 = vsel %vm454_vm1, %v937_v7, 0.0 }
 0x776   : > { %942 = vadd.xlane.f32.xlu2 %v941_v29 }
 0x7e1   : > { %v940_v31 = vpop.xlane.xlu0 %939 }
 0x7e2   : > { %v944_v32 = vmul.f32 %v940_v31, %v1695_v15 }
 0x7e4   : > { %v946_v34 = vadd.f32 1e-05, %v944_v32 }
 0x7e6   : > { %1473 = vrsqrt.f32 %v946_v34  ;;  %vm954_vm0 = vweird.f32 %v946_v34 }
 0x7e9   : > { %v943_v35 = vpop.xlane.xlu2 %942 }
 0x7ea   : > { %v945_v36 = vmul.f32 %v943_v35, %v1695_v15  ;;  %v1431_v15 = vld [vmem:[%s1895_s7] ss:$0 sm:$0xff] }
 0x7ec   : > { %v1474_v37 = vpop.eup %1473  ;;  %v947_v38 = vadd.f32 1e-05, %v945_v36 }
 0x7ed   : > { %v949_v39 = vmul.f32 %v1474_v37, %v946_v34  ;;  %vm955_vm15 = vweird.f32 %v1474_v37 }
 0x7ee   : > { %1475 = vrsqrt.f32 %v947_v38  ;;  %vm956_vm2 = vmor %vm954_vm0, %vm955_vm15  ;;  %vm964_vm4 = vweird.f32 %v947_v38 }
 0x7ef   : > { %v950_v40 = vmul.f32 %v1474_v37, %v949_v39 }
 0x7f1   : > { %v951_v41 = vmul.f32 0.5, %v950_v40 }
 0x7f3   : > { %v952_v42 = vsub.f32 1.5, %v951_v41 }
 0x7f4   : > { %v1476_v63 = vpop.eup %1475 }
 0x7f5   : > { %v953_v43 = vmul.f32 %v1474_v37, %v952_v42  ;;  %v959_v44 = vmul.f32 %v1476_v63, %v947_v38  ;;  %vm965_vm3 = vweird.f32 %v1476_v63  ;;  %v1365_v38 = vld [vmem:[%s1899_s11 + $0x8] sm:$0xff] }
 0x7f6   : > { %vm966_vm5 = vmor %vm964_vm4, %vm965_vm3 }
 0x7f7   : > { %v960_v45 = vmul.f32 %v1476_v63, %v959_v44  ;;  %v957_v46 = vsel %vm956_vm2, %v1474_v37, %v953_v43  ;;  %v1364_v43 = vld [vmem:[%s1899_s11] sm:$0xff] }
 0x7f8   : > { %v968_v49 = vmul.f32 %v957_v46, %v934_v24  ;;  %v1367_v24 = vld [vmem:[%s1899_s11 + $0x18] sm:$0xff] }
 0x7f9   : > { %v961_v47 = vmul.f32 0.5, %v960_v45  ;;  %1179 = vmatpush.bf16.msrb.mxu3 %v1367_v24 }
 0x7fa   : > { %v973_v53 = vmul.f32 %v1431_v15, %v968_v49 }
 0x7fb   : > { %v962_v48 = vsub.f32 1.5, %v961_v47 }
 0x7fc   : > { %v978_v56 = vadd.f32 %v1432_v52, %v973_v53 }
 0x7fd   : > { %v963_v50 = vmul.f32 %v1476_v63, %v962_v48  ;;  %1180 = vmatpush.bf16.msrb.mxu3 %v1366_v30 }
 0x7ff   : > { %v967_v51 = vsel %vm966_vm5, %v1476_v63, %v963_v50 }
 0x800   : > { %v969_v54 = vmul.f32 %v967_v51, %v935_v28 }
 0x801   : > { %1181 = vmatpush.bf16.msrb.mxu3 %v1365_v38 }
 0x802   : > { %v974_v55 = vmul.f32 %v1431_v15, %v969_v54 }
 0x804   : > { %v979_v57 = vadd.f32 %v1432_v52, %v974_v55 }
 0x805   : > { %1182 = vmatpush.bf16.msrb.mxu3 %v1364_v43 }
 0x806   : > { %v980_v58 = vpack.c.bf16 %v979_v57, %v978_v56 }
 0x808   : > { %1316 = vmatmul.msk.bf16.vlgmr.msra.gmra.mxu1 %vm454_vm1, %v980_v58 }
 0x885   : > { %v1013_v60 = vpop.f32.mrf.mxu1 }
 0x886   : > { %v1806_v61 = vadd.f32 %v1433_v59, %v1013_v60 }
 0x888   : > { %v1812_v0 = vmul.f32 0.70710677, %v1806_v61 }
 0x88a   : > { %v1022_v1 = vmul.f32 %v1812_v0, %v1812_v0 }
 0x88c   : > { %v1023_v3 = vmin.f32 %v1022_v1, 16.0 }
 0x88d   : > { %v1015_v5 = vpop.f32.mrf.mxu1 }
 0x88e   : > { %v1024_v6 = vmul.f32 2.1237322e-06, %v1023_v3  ;;  %v1035_v8 = vmul.f32 3.8918573e-05, %v1023_v3  ;;  %v1819_v9 = vadd.f32 %v1433_v59, %v1015_v5 }
 0x890   : > { %v1025_v11 = vadd.f32 0.00028619796, %v1024_v6  ;;  %v1036_v12 = vadd.f32 0.001143296, %v1035_v8  ;;  %v1825_v13 = vmul.f32 0.70710677, %v1819_v9 }
 0x892   : > { %v1037_v14 = vmul.f32 %v1036_v12, %v1023_v3  ;;  %v1062_v18 = vmul.f32 %v1825_v13, %v1825_v13  ;;  %v1026_v19 = vmul.f32 %v1025_v11, %v1023_v3 }
 0x894   : > { %v1038_v21 = vadd.f32 0.014752088, %v1037_v14  ;;  %v1063_v22 = vmin.f32 %v1062_v18, 16.0  ;;  %v1027_v26 = vadd.f32 0.0036580483, %v1026_v19 }
 0x896   : > { %v1039_v23 = vmul.f32 %v1038_v21, %v1023_v3  ;;  %v1064_v4 = vmul.f32 2.1237322e-06, %v1063_v22  ;;  %v1075_v25 = vmul.f32 3.8918573e-05, %v1063_v22  ;;  %v1028_v33 = vmul.f32 %v1027_v26, %v1023_v3 }
 0x898   : > { %v1040_v27 = vadd.f32 0.112945676, %v1039_v23  ;;  %v1065_v28 = vadd.f32 0.00028619796, %v1064_v4  ;;  %v1076_v7 = vadd.f32 0.001143296, %v1075_v25 }
 0x899   : > { %v1029_v40 = vadd.f32 0.05243302, %v1028_v33 }
 0x89a   : > { %v1041_v29 = vmul.f32 %v1040_v27, %v1023_v3  ;;  %v1066_v31 = vmul.f32 %v1065_v28, %v1063_v22  ;;  %v1077_v32 = vmul.f32 %v1076_v7, %v1063_v22  ;;  %v1018_v27 = vmul.f32 0.5, %v1806_v61 }
 0x89b   : > { %v1030_v45 = vmul.f32 %v1029_v40, %v1023_v3  ;;  %v1019_v28 = vmul.f32 0.5, %v1819_v9 }
 0x89c   : > { %v1042_v34 = vadd.f32 0.4994258, %v1041_v29  ;;  %v1067_v35 = vadd.f32 0.0036580483, %v1066_v31  ;;  %v1078_v36 = vadd.f32 0.014752088, %v1077_v32 }
 0x89d   : > { %v1031_v49 = vadd.f32 0.18741608, %v1030_v45 }
 0x89e   : > { %v1043_v37 = vmul.f32 %v1042_v34, %v1023_v3  ;;  %v1079_v39 = vmul.f32 %v1078_v36, %v1063_v22  ;;  %v1068_v42 = vmul.f32 %v1067_v35, %v1063_v22 }
 0x89f   : > { %v1032_v54 = vmul.f32 %v1031_v49, %v1023_v3 }
 0x8a0   : > { %v1044_v41 = vadd.f32 1.0, %v1043_v37  ;;  %v1080_v63 = vadd.f32 0.112945676, %v1079_v39  ;;  %v1069_v46 = vadd.f32 0.05243302, %v1068_v42 }
 0x8a1   : > { %v1033_v60 = vadd.f32 1.1283791, %v1032_v54 }
 0x8a2   : > { %1477 = vrcp.f32 %v1044_v41  ;;  %v1081_v44 = vmul.f32 %v1080_v63, %v1063_v22  ;;  %v1070_v51 = vmul.f32 %v1069_v46, %v1063_v22  ;;  %v1056_v56 = vand.u32 2147483648, %v1044_v41 }
 0x8a3   : > { %v1054_v58 = vand.u32 2147483647, %v1044_v41  ;;  %vm1050_vm7 = vweird.f32 %v1044_v41  ;;  %v1034_v10 = vmul.f32 %v1033_v60, %v1812_v0 }
 0x8a4   : > { %v1082_v47 = vadd.f32 0.4994258, %v1081_v44  ;;  %v1071_v57 = vadd.f32 0.18741608, %v1070_v51  ;;  %v1057_v2 = vor.u32 1.1754944e-38, %v1056_v56 }
 0x8a5   : > { %vm1055_vm9 = vcmp.eq.f32.partialorder %v1054_v58, 8.507059e+37 }
 0x8a6   : > { %v1083_v48 = vmul.f32 %v1082_v47, %v1063_v22  ;;  %v1072_v5 = vmul.f32 %v1071_v57, %v1063_v22 }
 0x8a8   : > { %v1478_v15 = vpop.eup %1477  ;;  %v1084_v52 = vadd.f32 1.0, %v1083_v48  ;;  %v1073_v3 = vadd.f32 1.1283791, %v1072_v5 }
 0x8a9   : > { %v1046_v50 = vmul.f32 %v1478_v15, %v1044_v41  ;;  %vm1051_vm6 = vweird.f32 %v1478_v15 }
 0x8aa   : > { %1479 = vrcp.f32 %v1084_v52  ;;  %vm1052_vm8 = vmor %vm1050_vm7, %vm1051_vm6  ;;  %v1096_v12 = vand.u32 2147483648, %v1084_v52  ;;  %v1094_v18 = vand.u32 2147483647, %v1084_v52  ;;  %vm1090_vm11 = vweird.f32 %v1084_v52 }
 0x8ab   : > { %v1047_v53 = vsub.f32 1.0, %v1046_v50  ;;  %v1074_v22 = vmul.f32 %v1073_v3, %v1825_v13  ;;  %v1434_v13 = vld [vmem:[%s1900_s12] ss:$0 sm:$0xff] }
 0x8ac   : > { %v1097_v21 = vor.u32 1.1754944e-38, %v1096_v12  ;;  %vm1095_vm13 = vcmp.eq.f32.partialorder %v1094_v18, 8.507059e+37 }
 0x8ad   : > { %v1048_v55 = vmul.f32 %v1478_v15, %v1047_v53 }
 0x8af   : > { %v1049_v59 = vadd.f32 %v1478_v15, %v1048_v55 }
 0x8b0   : > { %v1480_v62 = vpop.eup %1479 }
 0x8b1   : > { %v1053_v1 = vsel %vm1052_vm8, %v1478_v15, %v1049_v59  ;;  %v1086_v6 = vmul.f32 %v1480_v62, %v1084_v52  ;;  %vm1091_vm10 = vweird.f32 %v1480_v62 }
 0x8b2   : > { %v1058_v8 = vsel %vm1055_vm9, %v1057_v2, %v1053_v1  ;;  %vm1092_vm12 = vmor %vm1090_vm11, %vm1091_vm10 }
 0x8b3   : > { %v1087_v11 = vsub.f32 1.0, %v1086_v6  ;;  %v1059_v14 = vmul.f32 %v1058_v8, %v1034_v10 }
 0x8b5   : > { %v1088_v17 = vmul.f32 %v1480_v62, %v1087_v11  ;;  %v1317_v23 = vclamps-f32 %v1059_v14, 1.0 }
 0x8b7   : > { %v1089_v19 = vadd.f32 %v1480_v62, %v1088_v17  ;;  %v1102_v25 = vadd.f32 1.0, %v1317_v23 }
 0x8b9   : > { %v1093_v24 = vsel %vm1092_vm12, %v1480_v62, %v1089_v19  ;;  %v1104_v29 = vmul.f32 %v1102_v25, %v1018_v27 }
 0x8ba   : > { %v1098_v4 = vsel %vm1095_vm13, %v1097_v21, %v1093_v24 }
 0x8bb   : > { %v1099_v0 = vmul.f32 %v1098_v4, %v1074_v22 }
 0x8bd   : > { %v1318_v26 = vclamps-f32 %v1099_v0, 1.0 }
 0x8bf   : > { %v1103_v7 = vadd.f32 1.0, %v1318_v26 }
 0x8c1   : > { %v1105_v30 = vmul.f32 %v1103_v7, %v1019_v28 }
 0x8c3   : > { %v1106_v31 = vpack.c.bf16 %v1105_v30, %v1104_v29 }
 0x8c5   : > { %1183 = vmatmul.bf16.vlgmr.msrb.gmra.mxu3 %v1106_v31 }
 0x948   : > { %v1184_v32 = vpop.f32.mrf.mxu3 }
 0x949   : > { %v1185_v33 = vadd.f32 %v1434_v13, %v1184_v32 }
 0x94b   : > { %v1189_v34 = vadd.f32 %v1185_v33, %v1773_v16 }
 0x94d   : > { %1191 = vst.msk [vmem:[%s433_s16] sm:$0xff] %vm454_vm1, %v1189_v34 }
 0x950   : > { %v1186_v61 = vpop.f32.mrf.mxu3 }
 0x951   : > { %v1187_v9 = vadd.f32 %v1434_v13, %v1186_v61 }
 0x953   : > { %v1190_v35 = vadd.f32 %v1187_v9, %v1778_v20 }
 0x955   : > { %1192 = vst.msk [vmem:[%s433_s16 + $0x8] sm:$0xff] %vm454_vm1, %v1190_v35 }
 0x956   : > { %1508 = shalt.err (!%p1505_p3)
}
 0x957   : > { %s1560_s21 = smov 128   ;;  %s1911_s16 = smov 8  }
 0x958   : > { %1373 = dma.vmem_to_hbm [thread:$0]  (%p1669_p5), %s1207_s1, 256, %s1209_s2, %s1194_s29, %s1560_s21, %s1560_s21, %s1911_s16  }
 0x959 PF: > { %p1379_p4 = scmp.ge.s32.totalorder %s1543_s28, 2  ;;  %s1223_s22 = sand.u32 1, %s1531_s25  }
 0x95a   : > { %s1224_s30 = scalar_lea.sflag [#allocation4], %s1223_s22 }
 0x95b   : > { %p1376_p7 = pnand %p1379_p4, %p1673_p6 }
 0x95d   : > { %p1377_p8 = pneg %p1376_p7 }
 0x95f   : > { %1526 = dma.done.wait (%p1377_p8), %s1224_s30, 256  }
 0x960   : > { %1528 = vsyncadd (%p1377_p8), %s1224_s30, 4294967040  ;;  %p23_p9 = scmp.ge.s32.totalorder %s1656_s14, 4   ;;  %s1912_s25 = smov %s1535_s26 }
 0x961   : > { %s1913_s26 = smov %s1539_s27  ;;  %s1914_s27 = smov %s1667_s17 }
 0x962   : > { %s1915_s28 = smov %s1656_s14  ;;  %25 = sbr.rel (!%p23_p9) target bundleno = 7 (0x7), region = 107 }
 0x967   :  { %1230 = vsyncpa [#allocation4], 1 }
 0x968   :  { %1232 = vsyncpa [#allocation4 + $0x1], 1 }

</bundles_post_ra>
